<compile_context>
chip_gen: v5e
topology: v5e:2x2
jax: 0.10.0
libtpu: 0.0.40
codegen_flags: <defaults>
</compile_context>

<pallas_src>
import jax
import jax.numpy as jnp
from jax.experimental import pallas as pl
from jax.experimental.pallas import tpu as pltpu


def _make_vmem_gather_kernel(sb: int, batch: int):
    """Small-table path: table resident in VMEM, per-token dynamic vector loads."""
    tokens = sb * batch

    def kernel(ids_ref, w_ref, o_ref):
        # ids_ref : SMEM (S_pad*B,) int32, flattened s-major (flat index = s*B + b)
        # w_ref   : VMEM (V, H) embedding table (same block every grid step -> resident)
        # o_ref   : VMEM (sb, B, H) output block in the final [S, B, H] layout
        base = pl.program_id(0) * tokens
        for t in range(tokens):
            row = ids_ref[base + t]
            o_ref[t // batch, t % batch, :] = w_ref[row, :].astype(o_ref.dtype)

    return kernel


def _make_hbm_gather_kernel(sb: int, batch: int, chunk_pos: int, n_slots: int,
                            needs_cast: bool):
    """Large-table path: chunked row-gather DMAs from HBM with a small in-flight window."""
    tokens = sb * batch
    chunk_tokens = chunk_pos * batch
    n_chunks = sb // chunk_pos
    assert n_chunks * chunk_pos == sb

    def kernel(ids_ref, w_hbm, o_ref, *rest):
        # ids_ref : SMEM (S_pad*B,) int32
        # w_hbm   : HBM  (V, H) embedding table (no auto-DMA)
        # o_ref   : VMEM (sb, B, H) output block
        # rest    : [row_buf (n_slots, chunk_pos, B, H) if needs_cast] + [DMA sems (n_slots,)]
        if needs_cast:
            row_buf, sems = rest
        else:
            (sems,) = rest

        base = pl.program_id(0) * tokens
        pending = {}  # chunk index -> list of live copy descriptors (kept for the waits)

        def dst(c, t):
            if needs_cast:
                return row_buf.at[c % n_slots, t // batch, t % batch]
            # Gather straight into the pipelined output block (no VMEM round trip).
            return o_ref.at[c * chunk_pos + t // batch, t % batch]

        def start(c):
            slot = c % n_slots
            descs = []
            for t in range(chunk_tokens):
                row = ids_ref[base + c * chunk_tokens + t]
                cp = pltpu.make_async_copy(w_hbm.at[row], dst(c, t), sems.at[slot])
                cp.start()
                descs.append(cp)
            pending[c] = descs

        def finish(c):
            for cp in pending.pop(c):
                cp.wait()
            if needs_cast:
                # Per-chunk fp32-residual cast, overlapped with still-outstanding DMAs.
                o_ref[pl.ds(c * chunk_pos, chunk_pos), :, :] = (
                    row_buf[c % n_slots].astype(o_ref.dtype))

        lookahead = min(n_slots, n_chunks)
        for c in range(lookahead):            # prime the in-flight window
            start(c)
        for c in range(n_chunks):             # drain chunk c, refill the window
            finish(c)
            if c + lookahead < n_chunks:
                start(c + lookahead)

    return kernel


def embedding_forward(input_ids, weight, *, fp32_residual_connection: bool = False,
                      force_hbm_gather: bool = False):
    """input_ids: [batch, seq] int; weight: [vocab, hidden] -> [seq, batch, hidden]."""
    B, S = input_ids.shape
    V, H = weight.shape

    out_dtype = jnp.float32 if fp32_residual_connection else weight.dtype
    needs_cast = jnp.dtype(out_dtype) != jnp.dtype(weight.dtype)
    tbl_isize = jnp.dtype(weight.dtype).itemsize
    out_isize = jnp.dtype(out_dtype).itemsize
    table_bytes = V * H * tbl_isize

    # ---- block of sequence positions per grid step (VMEM-budget sized) ----
    OUT_BLOCK_BUDGET = 4 << 20     # ~4 MiB output block; x2 double-buffer stays well
                                   # under v7x's 64 MiB per-TC VMEM
    MAX_TOKENS_PER_STEP = 256      # caps in-flight row DMAs / unrolled descriptor code
    sb = max(1, OUT_BLOCK_BUDGET // max(1, B * H * out_isize))
    sb = min(sb, max(1, MAX_TOKENS_PER_STEP // B))
    if S > 1:
        sb = min(sb, (S + 1) // 2)  # keep >= 2 grid steps so ("parallel",) uses both v7x TCs
    sb = max(1, min(sb, S))

    use_vmem_table = (table_bytes <= (2 << 20)) and not force_hbm_gather

    chunk_pos = n_slots = 1
    if not use_vmem_table:
        # ~32 gather rows per chunk, up to 4 chunks (semaphore slots) in flight.
        chunk_pos = max(1, min(sb, max(1, 32 // B)))
        sb = max(chunk_pos, (sb // chunk_pos) * chunk_pos)
        n_slots = min(4, sb // chunk_pos)

    n_steps = -(-S // sb)          # cdiv; last block is partial (masked writeback)
    s_pad = n_steps * sb

    # Token ids flattened in output (s-major) order, clipped to valid rows and padded so
    # every grid step has a full block of in-bounds gather indices.
    # TODO(synk): for very long contexts (S*B >~ 128K) block the ids per grid step instead
    # of scalar-prefetching the whole array into SMEM.
    ids_flat = jnp.transpose(jnp.clip(input_ids.astype(jnp.int32), 0, V - 1),
                             (1, 0)).reshape(-1)
    if s_pad != S:
        ids_flat = jnp.concatenate(
            [ids_flat, jnp.zeros(((s_pad - S) * B,), jnp.int32)])

    # Explicit scoped-VMEM limit: double-buffered output block (+ resident table or
    # cast staging), clamped to be safe on v5e (16 MiB default) and v7x (64 MiB physical).
    vmem_needed = 2 * sb * B * H * out_isize
    if use_vmem_table:
        vmem_needed += 2 * table_bytes
    elif needs_cast:
        vmem_needed += n_slots * chunk_pos * B * H * tbl_isize
    vmem_limit = int(min(64 << 20, max(32 << 20, 2 * vmem_needed)))

    compiler_params = pltpu.CompilerParams(
        dimension_semantics=("parallel",),
        vmem_limit_bytes=vmem_limit,
    )
    cost = pl.CostEstimate(
        flops=0,
        transcendentals=0,
        bytes_accessed=S * B * H * (tbl_isize + out_isize) + S * B * 4,
    )
    out_shape = jax.ShapeDtypeStruct((S, B, H), out_dtype)

    if use_vmem_table:
        grid_spec = pltpu.PrefetchScalarGridSpec(
            num_scalar_prefetch=1,
            grid=(n_steps,),
            in_specs=[pl.BlockSpec((V, H), lambda i, ids: (0, 0))],   # table resident in VMEM
            out_specs=pl.BlockSpec((sb, B, H), lambda i, ids: (i, 0, 0)),
        )
        kernel = _make_vmem_gather_kernel(sb, B)
    else:
        scratch = []
        if needs_cast:
            scratch.append(pltpu.VMEM((n_slots, chunk_pos, B, H), weight.dtype))
        scratch.append(pltpu.SemaphoreType.DMA((n_slots,)))
        grid_spec = pltpu.PrefetchScalarGridSpec(
            num_scalar_prefetch=1,
            grid=(n_steps,),
            in_specs=[pl.BlockSpec(memory_space=pl.ANY)],             # table stays in HBM
            out_specs=pl.BlockSpec((sb, B, H), lambda i, ids: (i, 0, 0)),
            scratch_shapes=scratch,
        )
        kernel = _make_hbm_gather_kernel(sb, B, chunk_pos, n_slots, needs_cast)

    return pl.pallas_call(
        kernel,
        out_shape=out_shape,
        grid_spec=grid_spec,
        compiler_params=compiler_params,
        cost_estimate=cost,
    )(ids_flat, weight)


def _reference(input_ids, weight, fp32_residual_connection=False):
    emb = jnp.take(weight, input_ids, axis=0)          # [B, S, H]
    emb = jnp.transpose(emb, (1, 0, 2))                # [S, B, H]
    if fp32_residual_connection:
        emb = emb.astype(jnp.float32)
    return emb


if __name__ == "__main__":
    key = jax.random.PRNGKey(0)
    k_ids, k_ids2, k_w, k_w2 = jax.random.split(key, 4)

    # Small shapes consistent with the module: padded_vocab=128, hidden=256, batch=2, seq=8.
    vocab, hidden, batch, seq = 128, 256, 2, 8
    input_ids = jax.random.randint(k_ids, (batch, seq), 0, vocab, dtype=jnp.int32)
    weight = jax.random.normal(k_w, (vocab, hidden), dtype=jnp.float32)

    # Case 1: small-table fast path (table resident in VMEM), f32 weights, no cast.
    out = jax.block_until_ready(embedding_forward(input_ids, weight))
    ref = _reference(input_ids, weight)
    assert out.shape == (seq, batch, hidden)
    assert out.dtype == ref.dtype
    assert jnp.array_equal(out, ref)                   # pure gather -> bit-exact

    # Case 2: HBM row-gather path, odd seq length (partial last block), bf16 table
    #         with fp32_residual_connection=True (per-chunk cast path).
    seq2 = 7
    ids2 = jax.random.randint(k_ids2, (batch, seq2), 0, vocab, dtype=jnp.int32)
    w_bf16 = jax.random.normal(k_w2, (vocab, hidden), dtype=jnp.float32).astype(jnp.bfloat16)
    out2 = jax.block_until_ready(
        embedding_forward(ids2, w_bf16, fp32_residual_connection=True,
                          force_hbm_gather=True))
    ref2 = _reference(ids2, w_bf16, fp32_residual_connection=True)
    assert out2.shape == (seq2, batch, hidden)
    assert out2.dtype == jnp.float32
    assert jnp.array_equal(out2, ref2)                 # gather + exact bf16->f32 upcast

    # Case 3: HBM row-gather path without cast (DMA straight into the output block).
    out3 = jax.block_until_ready(
        embedding_forward(input_ids, weight, force_hbm_gather=True))
    assert jnp.array_equal(out3, ref)

    print("KERNEL_OK")
</pallas_src>

<mosaic_0001>
module attributes {stable_mosaic.version = 11 : i64} {
  func.func @kernel(%arg0: i32, %arg1: memref<16xi32, #tpu.memory_space<smem>>, %arg2: memref<128x256xf32, #tpu.memory_space<vmem>>, %arg3: memref<4x2x256xf32, #tpu.memory_space<vmem>>) attributes {dimension_semantics = [#tpu.dimension_semantics<parallel>], iteration_bounds = array<i64: 2>, scalar_prefetch = 1 : i64, scratch_operands = 0 : i64, tpu.core_type = #tpu.core_type<tc>, window_params = [{pipeline_mode = #tpu.pipeline_mode<synchronous>, transform_indices = @transform_0, window_bounds = array<i64: 128, 256>}, {transform_indices = @transform_1, window_bounds = array<i64: 4, 2, 256>}]} {
    %c8_i32 = arith.constant 8 : i32
    %0 = arith.muli %arg0, %c8_i32 : i32
    %c0_i32 = arith.constant 0 : i32
    %1 = arith.addi %0, %c0_i32 : i32
    %2 = arith.index_cast %1 : i32 to index
    %3 = memref.load %arg1[%2] : memref<16xi32, #tpu.memory_space<smem>>
    %4 = arith.index_cast %3 : i32 to index
    %c0 = arith.constant 0 : index
    %5 = vector.load %arg2[%4, %c0] : memref<128x256xf32, #tpu.memory_space<vmem>>, vector<1x256xf32>
    %6 = vector.shape_cast %5 : vector<1x256xf32> to vector<256xf32>
    %c0_0 = arith.constant 0 : index
    %c0_1 = arith.constant 0 : index
    %c0_2 = arith.constant 0 : index
    %7 = vector.load %arg3[%c0_0, %c0_1, %c0_2] : memref<4x2x256xf32, #tpu.memory_space<vmem>>, vector<1x1x256xf32>
    %8 = vector.shape_cast %7 : vector<1x1x256xf32> to vector<256xf32>
    %9 = vector.shape_cast %6 : vector<256xf32> to vector<1x1x256xf32>
    tpu.vector_store %arg3[%c0_0, %c0_1, %c0_2], %9 {strides = array<i32>} : memref<4x2x256xf32, #tpu.memory_space<vmem>>, vector<1x1x256xf32>,
    %c1_i32 = arith.constant 1 : i32
    %10 = arith.addi %0, %c1_i32 : i32
    %11 = arith.index_cast %10 : i32 to index
    %12 = memref.load %arg1[%11] : memref<16xi32, #tpu.memory_space<smem>>
    %13 = arith.index_cast %12 : i32 to index
    %c0_3 = arith.constant 0 : index
    %14 = vector.load %arg2[%13, %c0_3] : memref<128x256xf32, #tpu.memory_space<vmem>>, vector<1x256xf32>
    %15 = vector.shape_cast %14 : vector<1x256xf32> to vector<256xf32>
    %c0_4 = arith.constant 0 : index
    %c1 = arith.constant 1 : index
    %c0_5 = arith.constant 0 : index
    %16 = vector.load %arg3[%c0_4, %c1, %c0_5] : memref<4x2x256xf32, #tpu.memory_space<vmem>>, vector<1x1x256xf32>
    %17 = vector.shape_cast %16 : vector<1x1x256xf32> to vector<256xf32>
    %18 = vector.shape_cast %15 : vector<256xf32> to vector<1x1x256xf32>
    tpu.vector_store %arg3[%c0_4, %c1, %c0_5], %18 {strides = array<i32>} : memref<4x2x256xf32, #tpu.memory_space<vmem>>, vector<1x1x256xf32>,
    %c2_i32 = arith.constant 2 : i32
    %19 = arith.addi %0, %c2_i32 : i32
    %20 = arith.index_cast %19 : i32 to index
    %21 = memref.load %arg1[%20] : memref<16xi32, #tpu.memory_space<smem>>
    %22 = arith.index_cast %21 : i32 to index
    %c0_6 = arith.constant 0 : index
    %23 = vector.load %arg2[%22, %c0_6] : memref<128x256xf32, #tpu.memory_space<vmem>>, vector<1x256xf32>
    %24 = vector.shape_cast %23 : vector<1x256xf32> to vector<256xf32>
    %c1_7 = arith.constant 1 : index
    %c0_8 = arith.constant 0 : index
    %c0_9 = arith.constant 0 : index
    %25 = vector.load %arg3[%c1_7, %c0_8, %c0_9] : memref<4x2x256xf32, #tpu.memory_space<vmem>>, vector<1x1x256xf32>
    %26 = vector.shape_cast %25 : vector<1x1x256xf32> to vector<256xf32>
    %27 = vector.shape_cast %24 : vector<256xf32> to vector<1x1x256xf32>
    tpu.vector_store %arg3[%c1_7, %c0_8, %c0_9], %27 {strides = array<i32>} : memref<4x2x256xf32, #tpu.memory_space<vmem>>, vector<1x1x256xf32>,
    %c3_i32 = arith.constant 3 : i32
    %28 = arith.addi %0, %c3_i32 : i32
    %29 = arith.index_cast %28 : i32 to index
    %30 = memref.load %arg1[%29] : memref<16xi32, #tpu.memory_space<smem>>
    %31 = arith.index_cast %30 : i32 to index
    %c0_10 = arith.constant 0 : index
    %32 = vector.load %arg2[%31, %c0_10] : memref<128x256xf32, #tpu.memory_space<vmem>>, vector<1x256xf32>
    %33 = vector.shape_cast %32 : vector<1x256xf32> to vector<256xf32>
    %c1_11 = arith.constant 1 : index
    %c1_12 = arith.constant 1 : index
    %c0_13 = arith.constant 0 : index
    %34 = vector.load %arg3[%c1_11, %c1_12, %c0_13] : memref<4x2x256xf32, #tpu.memory_space<vmem>>, vector<1x1x256xf32>
    %35 = vector.shape_cast %34 : vector<1x1x256xf32> to vector<256xf32>
    %36 = vector.shape_cast %33 : vector<256xf32> to vector<1x1x256xf32>
    tpu.vector_store %arg3[%c1_11, %c1_12, %c0_13], %36 {strides = array<i32>} : memref<4x2x256xf32, #tpu.memory_space<vmem>>, vector<1x1x256xf32>,
    %c4_i32 = arith.constant 4 : i32
    %37 = arith.addi %0, %c4_i32 : i32
    %38 = arith.index_cast %37 : i32 to index
    %39 = memref.load %arg1[%38] : memref<16xi32, #tpu.memory_space<smem>>
    %40 = arith.index_cast %39 : i32 to index
    %c0_14 = arith.constant 0 : index
    %41 = vector.load %arg2[%40, %c0_14] : memref<128x256xf32, #tpu.memory_space<vmem>>, vector<1x256xf32>
    %42 = vector.shape_cast %41 : vector<1x256xf32> to vector<256xf32>
    %c2 = arith.constant 2 : index
    %c0_15 = arith.constant 0 : index
    %c0_16 = arith.constant 0 : index
    %43 = vector.load %arg3[%c2, %c0_15, %c0_16] : memref<4x2x256xf32, #tpu.memory_space<vmem>>, vector<1x1x256xf32>
    %44 = vector.shape_cast %43 : vector<1x1x256xf32> to vector<256xf32>
    %45 = vector.shape_cast %42 : vector<256xf32> to vector<1x1x256xf32>
    tpu.vector_store %arg3[%c2, %c0_15, %c0_16], %45 {strides = array<i32>} : memref<4x2x256xf32, #tpu.memory_space<vmem>>, vector<1x1x256xf32>,
    %c5_i32 = arith.constant 5 : i32
    %46 = arith.addi %0, %c5_i32 : i32
    %47 = arith.index_cast %46 : i32 to index
    %48 = memref.load %arg1[%47] : memref<16xi32, #tpu.memory_space<smem>>
    %49 = arith.index_cast %48 : i32 to index
    %c0_17 = arith.constant 0 : index
    %50 = vector.load %arg2[%49, %c0_17] : memref<128x256xf32, #tpu.memory_space<vmem>>, vector<1x256xf32>
    %51 = vector.shape_cast %50 : vector<1x256xf32> to vector<256xf32>
    %c2_18 = arith.constant 2 : index
    %c1_19 = arith.constant 1 : index
    %c0_20 = arith.constant 0 : index
    %52 = vector.load %arg3[%c2_18, %c1_19, %c0_20] : memref<4x2x256xf32, #tpu.memory_space<vmem>>, vector<1x1x256xf32>
    %53 = vector.shape_cast %52 : vector<1x1x256xf32> to vector<256xf32>
    %54 = vector.shape_cast %51 : vector<256xf32> to vector<1x1x256xf32>
    tpu.vector_store %arg3[%c2_18, %c1_19, %c0_20], %54 {strides = array<i32>} : memref<4x2x256xf32, #tpu.memory_space<vmem>>, vector<1x1x256xf32>,
    %c6_i32 = arith.constant 6 : i32
    %55 = arith.addi %0, %c6_i32 : i32
    %56 = arith.index_cast %55 : i32 to index
    %57 = memref.load %arg1[%56] : memref<16xi32, #tpu.memory_space<smem>>
    %58 = arith.index_cast %57 : i32 to index
    %c0_21 = arith.constant 0 : index
    %59 = vector.load %arg2[%58, %c0_21] : memref<128x256xf32, #tpu.memory_space<vmem>>, vector<1x256xf32>
    %60 = vector.shape_cast %59 : vector<1x256xf32> to vector<256xf32>
    %c3 = arith.constant 3 : index
    %c0_22 = arith.constant 0 : index
    %c0_23 = arith.constant 0 : index
    %61 = vector.load %arg3[%c3, %c0_22, %c0_23] : memref<4x2x256xf32, #tpu.memory_space<vmem>>, vector<1x1x256xf32>
    %62 = vector.shape_cast %61 : vector<1x1x256xf32> to vector<256xf32>
    %63 = vector.shape_cast %60 : vector<256xf32> to vector<1x1x256xf32>
    tpu.vector_store %arg3[%c3, %c0_22, %c0_23], %63 {strides = array<i32>} : memref<4x2x256xf32, #tpu.memory_space<vmem>>, vector<1x1x256xf32>,
    %c7_i32 = arith.constant 7 : i32
    %64 = arith.addi %0, %c7_i32 : i32
    %65 = arith.index_cast %64 : i32 to index
    %66 = memref.load %arg1[%65] : memref<16xi32, #tpu.memory_space<smem>>
    %67 = arith.index_cast %66 : i32 to index
    %c0_24 = arith.constant 0 : index
    %68 = vector.load %arg2[%67, %c0_24] : memref<128x256xf32, #tpu.memory_space<vmem>>, vector<1x256xf32>
    %69 = vector.shape_cast %68 : vector<1x256xf32> to vector<256xf32>
    %c3_25 = arith.constant 3 : index
    %c1_26 = arith.constant 1 : index
    %c0_27 = arith.constant 0 : index
    %70 = vector.load %arg3[%c3_25, %c1_26, %c0_27] : memref<4x2x256xf32, #tpu.memory_space<vmem>>, vector<1x1x256xf32>
    %71 = vector.shape_cast %70 : vector<1x1x256xf32> to vector<256xf32>
    %72 = vector.shape_cast %69 : vector<256xf32> to vector<1x1x256xf32>
    tpu.vector_store %arg3[%c3_25, %c1_26, %c0_27], %72 {strides = array<i32>} : memref<4x2x256xf32, #tpu.memory_space<vmem>>, vector<1x1x256xf32>,
    return
  }
  func.func @transform_0(%arg0: i32, %arg1: memref<16xi32, #tpu.memory_space<smem>>) -> (i32, i32) {
    %c0_i32 = arith.constant 0 : i32
    %c0_i32_0 = arith.constant 0 : i32
    %c0_i32_1 = arith.constant 0 : i32
    return %c0_i32, %c0_i32_0 : i32, i32
  }
  func.func @transform_1(%arg0: i32, %arg1: memref<16xi32, #tpu.memory_space<smem>>) -> (i32, i32, i32) {
    %c0_i32 = arith.constant 0 : i32
    %c0_i32_0 = arith.constant 0 : i32
    %c0_i32_1 = arith.constant 0 : i32
    return %arg0, %c0_i32, %c0_i32_0 : i32, i32, i32
  }
}

</mosaic_0001>

<bundles_post_ra>
// kernel: tpu_custom_call.1
= control target key start
LH: loop header
LB: loop body
LE: loop exit
PB: predicated region body
PF: predicated region fallthrough
CT: control target
= control target key end

     0   :  { %s548_s12 = smov [#allocation3]   ;;  %s717_s0 = inlined_call_operand.hbm [shape: s32[16], index: 0, kind: input, shape index: {}]   ;;  %s718_s1 = inlined_call_operand.hbm [shape: f32[128,256], index: 1, kind: input, shape index: {}]   ;;  %s719_s2 = inlined_call_operand.hbm [shape: f32[8,2,256], index: 2, kind: output, shape index: {}]  }
   0x1   :  { %s8_s11 = sshll.u32 %s717_s0, 4  ;;  %s9_s11 = int_to_ptr.hbm [resolvable:$true] %s8_s11 }
   0x2   :  { %11 = dma.hbm_to_smem %s9_s11, 16, %s548_s12, [#allocation2] }
   0x3   :  { %522 = dma.done.wait [#allocation2], 16 }
   0x4   :  { %523 = vsyncadd [#allocation2], 4294967280 }
   0x5   :  { %14 = sfence }
   0x6   :  { %15 = vsyncpa [#allocation5], 0 }
   0x7   :  { %16 = vsyncpa [#allocation6], 0 }
   0x8   :  { %18 = vsyncpa [#allocation6 + $0x1], 0  ;;  %s572_s13 = smov 0   ;;  %s574_s14 = smov 0  }
   0x9   :  { %s576_s15 = smov 0   ;;  %s578_s16 = smov 0  }
   0xa LB: > { %s593_s0 = sadd.s32 4294967295, %s546_s16   ;;  %s335_s17 = sadd.s32 4294967294, %s546_s16   ;;  %s546_s16 = sphi %s578_s16, %s727_s16   ;;  %s542_s15 = sphi %s576_s15, %s726_s15   ;;  %s538_s14 = sphi %s574_s14, %s725_s14   ;;  %s534_s13 = sphi %s572_s13, %s724_s13  }
   0xb   : > { %s597_s18 = sadd.s32 1, %s546_s16   ;;  %s52_s19 = sadd.s32 1, %s542_s15 }
   0xc   : > { %s49_s20 = ssub.s32 %s546_s16, %s597_s18  ;;  %p62_p0 = scmp.ne.s32.totalorder %s542_s15, %s538_s14 }
   0xd   : > { %p50_p1 = scmp.eq.s32.totalorder %s49_s20, 0  ;;  %p63_p2 = scmp.eq.s32.totalorder %s593_s0, 1 }
   0xe   : > { %p68_p3 = scmp.ne.s32.totalorder %s538_s14, %s534_s13  ;;  %p69_p4 = scmp.eq.s32.totalorder %s335_s17, 1 }
   0xf   : > { %s608_s21 = scalar_select %p50_p1, %s542_s15, %s52_s19  }
  0x10   : > { %p610_p5 = por %p63_p2, %p62_p0  ;;  %p614_p6 = por %p69_p4, %p68_p3 }
  0x11   : > { %p336_p7 = scmp.ge.s32.totalorder %s546_s16, 1  ;;  %p76_p8 = scmp.lt.s32.totalorder %s546_s16, 3 }
  0x12   : > { %p395_p9 = scmp.eq.s32.totalorder %s593_s0, 0  ;;  %s87_s26 = sshll.u32 %s718_s1, 4  ;;  %s88_s26 = int_to_ptr.hbm [resolvable:$true] %s87_s26 }
  0x13   : > { %p77_p10 = pnand %p336_p7, %p76_p8  ;;  %s549_s27 = smov [#allocation4]  }
  0x14   : > { %s89_s28 = sshll.u32 %s549_s27, 4  ;;  %s550_s29 = smov 256   ;;  %s90_s28 = int_to_ptr.vmem [resolvable:$true] %s89_s28 }
  0x15   : > { %p387_p11 = pneg %p77_p10  ;;  %s551_s30 = smov 16  }
  0x16   : > { %105 = sbr.rel (%p77_p10) target bundleno = 75 (0x4b), region = 24 }
  0x17   : > { %p388_p12 = pnand %p395_p9, %p387_p11 }
  0x19   : > { %390 = dma.hbm_to_vmem [thread:$0]  (!%p388_p12), %s88_s26, 4096, %s90_s28, [#allocation5], %s550_s29, %s550_s29, %s551_s30  }
  0x1b   : > { %525 = dma.done.wait (%p395_p9), [#allocation5], 4096  }
  0x1c   : > { %527 = vsyncadd (%p395_p9), [#allocation5], 4294963200  ;;  %s118_s3 = sand.u32 1, %s538_s14   ;;  %s632_s4 = sshll.u32 %s593_s0, 3  ;;  %v133_v0 = vlaneseq }
  0x1d   : > { %s340_s5 = sshll.u32 %s118_s3, 4  ;;  %s123_s6 = sld [smem:[#allocation3 + %s632_s4]] }
  0x1e   : > { %s138_s7 = sadd.s32 1, %s632_s4  ;;  %s638_s8 = scalar_lea.vmem [#allocation7], %s340_s5  ;;  %vm644_vm0 = vcmp.lt.s32.totalorder %v133_v0, 256 }
  0x1f   : > { %s243_s9 = sshll.u32 %s638_s8, 4  ;;  %s139_s10 = sld [smem:[#allocation3 + %s138_s7]]  ;;  %s676_s9 = int_to_ptr.vmem [resolvable:$true] %s243_s9 }
  0x20   : > { %s151_s11 = sadd.s32 2, %s632_s4  ;;  %s164_s12 = sadd.s32 3, %s632_s4 }
  0x21   : > { %s152_s17 = sld [smem:[#allocation3 + %s151_s11]]  ;;  %s177_s19 = sadd.s32 4, %s632_s4 }
  0x22   : > { %s165_s26 = sld [smem:[#allocation3 + %s164_s12]] }
  0x23   : > { %s124_s20 = sshra.s32 %s123_s6, 3  ;;  %s127_s24 = sand.u32 7, %s123_s6 }
  0x24   : > { %s371_s25 = sshll.u32 %s124_s20, 4  ;;  %s648_s28 = sld [smem:[#allocation3 + %s177_s19]] }
  0x25   : > { %s130_s27 = sadd.s32 %s371_s25, %s127_s24  ;;  %s140_s29 = sshra.s32 %s139_s10, 3 }
  0x26   : > { %s131_s30 = scalar_lea.vmem [#allocation4], %s130_s27  ;;  %s143_s5 = sand.u32 7, %s139_s10 }
  0x27   : > { %v132_v2 = vld [vmem:[%s131_s30] ss:$8 sm:$0x3]  ;;  %s372_s7 = sshll.u32 %s140_s29, 4  ;;  %s153_s11 = sshra.s32 %s152_s17, 3 }
  0x28   : > { %137 = vst.msk [vmem:[%s638_s8] ss:$2 sm:$0x3] %vm644_vm0, %v132_v2  ;;  %s146_s6 = sadd.s32 %s372_s7, %s143_s5  ;;  %s156_s12 = sand.u32 7, %s152_s17 }
  0x29   : > { %s147_s20 = scalar_lea.vmem [#allocation4], %s146_s6  ;;  %s373_s24 = sshll.u32 %s153_s11, 4 }
  0x2a   : > { %v148_v3 = vld [vmem:[%s147_s20] ss:$8 sm:$0x3]  ;;  %s166_s19 = sshra.s32 %s165_s26, 3  ;;  %s159_s10 = sadd.s32 %s373_s24, %s156_s12 }
  0x2b   : > { %346 = vst.msk [vmem:[%s638_s8 + $0x1] ss:$2 sm:$0x3] %vm644_vm0, %v148_v3  ;;  %s169_s25 = sand.u32 7, %s165_s26  ;;  %s374_s27 = sshll.u32 %s166_s19, 4 }
  0x2c   : > { %s160_s29 = scalar_lea.vmem [#allocation4], %s159_s10  ;;  %s172_s30 = sadd.s32 %s374_s27, %s169_s25 }
  0x2d   : > { %v161_v4 = vld [vmem:[%s160_s29] ss:$8 sm:$0x3]  ;;  %s179_s5 = sshra.s32 %s648_s28, 3  ;;  %s182_s17 = sand.u32 7, %s648_s28 }
  0x2e   : > { %349 = vst.msk [vmem:[%s638_s8 + $0x4] ss:$2 sm:$0x3] %vm644_vm0, %v161_v4  ;;  %s173_s7 = scalar_lea.vmem [#allocation4], %s172_s30  ;;  %s375_s6 = sshll.u32 %s179_s5, 4 }
  0x2f   : > { %v174_v5 = vld [vmem:[%s173_s7] ss:$8 sm:$0x3]  ;;  %s190_s11 = sadd.s32 5, %s632_s4  ;;  %s185_s26 = sadd.s32 %s375_s6, %s182_s17 }
  0x30   : > { %352 = vst.msk [vmem:[%s638_s8 + $0x5] ss:$2 sm:$0x3] %vm644_vm0, %v174_v5  ;;  %s191_s12 = sld [smem:[#allocation3 + %s190_s11]]  ;;  %s203_s20 = sadd.s32 6, %s632_s4 }
  0x31   : > { %s186_s24 = scalar_lea.vmem [#allocation4], %s185_s26  ;;  %s204_s19 = sld [smem:[#allocation3 + %s203_s20]] }
  0x32   : > { %v187_v6 = vld [vmem:[%s186_s24] ss:$8 sm:$0x3]  ;;  %s216_s10 = sadd.s32 7, %s632_s4  ;;  %s380_s25 = sshll.u32 %s593_s0, 4 }
  0x33   : > { %355 = vst.msk [vmem:[%s638_s8 + $0x8] ss:$2 sm:$0x3] %vm644_vm0, %v187_v6  ;;  %s217_s28 = sld [smem:[#allocation3 + %s216_s10]]  ;;  %s242_s30 = scalar_lea.hbm %s719_s2, %s380_s25 }
  0x34   : > { %s245_s6 = sshll.u32 %s242_s30, 4  ;;  %s230_s30 = scalar_lea.sflag [#allocation6], %s118_s3  ;;  %s246_s6 = int_to_ptr.hbm [resolvable:$true] %s245_s6 }
  0x36   : > { %s192_s5 = sshra.s32 %s191_s12, 3  ;;  %s195_s17 = sand.u32 7, %s191_s12 }
  0x37   : > { %s376_s7 = sshll.u32 %s192_s5, 4  ;;  %s205_s4 = sshra.s32 %s204_s19, 3 }
  0x38   : > { %s198_s11 = sadd.s32 %s376_s7, %s195_s17  ;;  %s208_s26 = sand.u32 7, %s204_s19 }
  0x39   : > { %s199_s20 = scalar_lea.vmem [#allocation4], %s198_s11  ;;  %s377_s0 = sshll.u32 %s205_s4, 4 }
  0x3a   : > { %v200_v7 = vld [vmem:[%s199_s20] ss:$8 sm:$0x3]  ;;  %s218_s24 = sshra.s32 %s217_s28, 3  ;;  %s211_s10 = sadd.s32 %s377_s0, %s208_s26 }
  0x3b   : > { %358 = vst.msk [vmem:[%s638_s8 + $0x9] ss:$2 sm:$0x3] %vm644_vm0, %v200_v7  ;;  %s221_s25 = sand.u32 7, %s217_s28  ;;  %s378_s27 = sshll.u32 %s218_s24, 4 }
  0x3c   : > { %s212_s12 = scalar_lea.vmem [#allocation4], %s211_s10  ;;  %s224_s29 = sadd.s32 %s378_s27, %s221_s25 }
  0x3d   : > { %v213_v8 = vld [vmem:[%s212_s12] ss:$8 sm:$0x3]  ;;  %s225_s19 = scalar_lea.vmem [#allocation4], %s224_s29  ;;  %s492_s5 = sshra.s32 %s246_s6, 4  ;;  %s493_s5 = int_to_ptr.hbm [resolvable:$true] %s492_s5 }
  0x3e   : > { %361 = vst.msk [vmem:[%s638_s8 + $0xc] ss:$2 sm:$0x3] %vm644_vm0, %v213_v8  ;;  %v226_v9 = vld [vmem:[%s225_s19] ss:$8 sm:$0x3]  ;;  %p499_p2 = scmp.lt.s32.totalorder %s493_s5, %s719_s2 }
  0x3f   : > { %364 = vst.msk [vmem:[%s638_s8 + $0xd] ss:$2 sm:$0x3] %vm644_vm0, %v226_v9  ;;  %s494_s17 = scalar_lea.hbm %s493_s5, 16  ;;  %s498_s11 = scalar_lea.hbm %s719_s2, 32 }
  0x40   : > { %p495_p13 = scmp.ne.s32.totalorder %s493_s5, %s494_s17  ;;  %p500_p3 = scmp.lt.s32.totalorder %s498_s11, %s494_s17 }
  0x42   : > { %p496_p0 = pnand %p495_p13, %p610_p5  ;;  %p501_p4 = por %p500_p3, %p499_p2 }
  0x44   : > { %p497_p1 = pneg %p496_p0 }
  0x46   : > { %p502_p7 = pnand %p501_p4, %p497_p1 }
  0x48   : > { %505 = shalt.err (!%p502_p7)
}
  0x49   : > { %s552_s3 = smov 64   ;;  %s553_s8 = smov 4  }
  0x4a   : > { %385 = dma.vmem_to_hbm [thread:$0]  (%p610_p5), %s676_s9, 256, %s246_s6, %s230_s30, %s552_s3, %s552_s3, %s553_s8  }
  0x4b PF: > { %p397_p8 = scmp.ge.s32.totalorder %s546_s16, 2  ;;  %s260_s20 = sand.u32 1, %s534_s13  }
  0x4c   : > { %s261_s0 = scalar_lea.sflag [#allocation6], %s260_s20 }
  0x4d   : > { %p392_p9 = pnand %p397_p8, %p614_p6 }
  0x4f   : > { %p393_p10 = pneg %p392_p9 }
  0x51   : > { %529 = dma.done.wait (%p393_p10), %s261_s0, 256  }
  0x52   : > { %531 = vsyncadd (%p393_p10), %s261_s0, 4294967040  ;;  %p21_p11 = scmp.ge.s32.totalorder %s597_s18, 4   ;;  %s724_s13 = smov %s538_s14 }
  0x53   : > { %s725_s14 = smov %s542_s15  ;;  %s726_s15 = smov %s608_s21 }
  0x54   : > { %s727_s16 = smov %s597_s18  ;;  %23 = sbr.rel (!%p21_p11) target bundleno = 10 (0xa), region = 76 }
  0x59   :  { %267 = vsyncpa [#allocation5], 1 }
  0x5a   :  { %269 = vsyncpa [#allocation5 + $0x1], 1 }
  0x5b   :  { %270 = vsyncpa [#allocation6], 1 }
  0x5c   :  { %272 = vsyncpa [#allocation6 + $0x1], 1 }

</bundles_post_ra>
